<compile_context>
chip_gen: v6e
topology: v6e:2x2x1
jax: 0.10.0
libtpu: 0.0.40
codegen_flags: <defaults>
</compile_context>

<pallas_src>
from functools import partial

import jax
import jax.numpy as jnp
from jax import lax
from jax.experimental import pallas as pl
from jax.experimental.pallas import tpu as pltpu

HEADS = 4
DIM_HEAD = 32
HIDDEN = HEADS * DIM_HEAD  # 128


# --------------------------------------------------------------------------- #
# helpers
# --------------------------------------------------------------------------- #
def _head_mask():
    """(128,128) 0/1 block-diagonal mask keeping per-head (32x32) ctx blocks."""
    r = jnp.arange(HIDDEN) // DIM_HEAD
    return (r[:, None] == r[None, :]).astype(jnp.float32)


def _vmem_capacity():
    try:
        return int(pltpu.get_tpu_info().vmem_capacity_bytes)
    except Exception:
        return 64 << 20  # conservative (v7x per-TC)


def _vmem_budget():
    # leave room for pipelining depth + compiler-internal scratch
    return _vmem_capacity() // 2


def _vmem_limit(requested):
    hi = max(_vmem_capacity() - (16 << 20), 32 << 20)
    return int(min(max(requested, 32 << 20), hi))


def _single_pass_vmem(C, N, out_isz):
    io = 2 * (4 * C * N) + 2 * (out_isz * C * N)                 # dbl-buffered in/out
    w = 2 * (2 * 3 * HIDDEN * C + 4 * C * HIDDEN + 4 * C + 4 * HIDDEN * HIDDEN)
    inter = N * (4 * 4 * HIDDEN + 3 * 2 * HIDDEN + 2 * C + 4 * C)
    return io + w + inter + (4 << 20)


def _phase1_vmem(C, nt):
    io = 2 * (4 * C * nt) + 2 * (2 * C * HIDDEN)
    w = 2 * (2 * 2 * HIDDEN * C + 4 * C * HIDDEN + 4 * HIDDEN * HIDDEN)
    inter = nt * (4 * 2 * HIDDEN + 4 * HIDDEN + 2 * 2 * HIDDEN + 2 * C)
    scratch = 4 * (HIDDEN * HIDDEN + 2 * HIDDEN) + 4 * HIDDEN * HIDDEN
    return io + w + inter + scratch + (4 << 20)


def _phase2_vmem(C, nt, out_isz):
    io = 2 * (4 * C * nt) + 2 * (out_isz * C * nt) + 2 * (2 * C * HIDDEN)
    w = 2 * (2 * HIDDEN * C + 4 * C)
    inter = nt * (4 * HIDDEN + 2 * HIDDEN + 2 * C + 4 * C)
    return io + w + inter + (4 << 20)


def _choose_tile(C, N, out_isz):
    budget = _vmem_budget()
    if _single_pass_vmem(C, N, out_isz) <= budget:
        return None  # single pass: minimum HBM traffic (x read exactly once)
    for nt in (1024, 512, 256, 128):
        if (N % nt == 0 and _phase1_vmem(C, nt) <= budget
                and _phase2_vmem(C, nt, out_isz) <= budget):
            return nt
    # TODO(synk): ragged N (not a multiple of 128) — fall back to single pass.
    return None


# --------------------------------------------------------------------------- #
# single-pass (whole-N) kernel — used when the footprint fits VMEM
# --------------------------------------------------------------------------- #
def _single_pass_kernel(x_ref, wqkv_ref, wout_ref, bout_ref, mask_ref, o_ref, *,
                        bf16_exp):
    # x_ref:    (1, C, N)  f32    wqkv_ref: (384, C) bf16   wout_ref: (C, 128) f32
    # bout_ref: (C, 1) f32        mask_ref: (128, 128) f32  o_ref: (1, C, N)
    x = x_ref[0].astype(jnp.bfloat16)                               # (C, N)

    # --- k pass: bf16 projection, f32 softmax statistics ---------------------
    k = jnp.dot(wqkv_ref[HIDDEN:2 * HIDDEN, :], x,
                preferred_element_type=jnp.float32)                 # (128, N)
    m = jnp.max(k, axis=-1, keepdims=True)                          # (128, 1)
    if bf16_exp:
        e_bf = jnp.exp((k - m).astype(jnp.bfloat16))
        e_f32 = e_bf.astype(jnp.float32)
    else:
        e_f32 = jnp.exp(k - m)
        e_bf = e_f32.astype(jnp.bfloat16)
    s = jnp.sum(e_f32, axis=-1, keepdims=True)                      # (128, 1) f32

    # --- ctx pass: all heads in one MXU matmul (bf16 in, f32 accum) ----------
    v = jnp.dot(wqkv_ref[2 * HIDDEN:3 * HIDDEN, :], x,
                preferred_element_type=jnp.float32)                 # (128, N)
    ctx_raw = lax.dot_general(e_bf, v.astype(jnp.bfloat16),
                              (((1,), (1,)), ((), ())),
                              preferred_element_type=jnp.float32)   # (128, 128)
    # fold softmax denominator (EUP reciprocal) + block-diag head mask
    ctx = ctx_raw * pl.reciprocal(s, approx=True) * mask_ref[...]
    # fold to_out weight: wprime[c, D] = sum_E wout[c, E] * ctx[D, E]
    wprime = lax.dot_general(wout_ref[...], ctx, (((1,), (1,)), ((), ())),
                             preferred_element_type=jnp.float32)    # (C, 128)

    # --- output pass: single fused (C,128)@(128,N) matmul, bias added once ---
    q = jnp.dot(wqkv_ref[0:HIDDEN, :], x,
                preferred_element_type=jnp.float32)                 # (128, N)
    out = jnp.dot(wprime.astype(jnp.bfloat16), q.astype(jnp.bfloat16),
                  preferred_element_type=jnp.float32)               # (C, N)
    o_ref[0] = (out + bout_ref[...]).astype(o_ref.dtype)


def _single_pass_forward(xf, w_qkv, wout, bout, mask, out_dtype, bf16_exp):
    B, C, N = xf.shape
    wqkv_bf = w_qkv.astype(jnp.bfloat16)
    return pl.pallas_call(
        partial(_single_pass_kernel, bf16_exp=bf16_exp),
        out_shape=jax.ShapeDtypeStruct((B, C, N), out_dtype),
        grid_spec=pltpu.PrefetchScalarGridSpec(
            num_scalar_prefetch=0,
            grid=(B,),
            in_specs=[
                pl.BlockSpec((1, C, N), lambda b: (b, 0, 0)),
                pl.BlockSpec((3 * HIDDEN, C), lambda b: (0, 0)),
                pl.BlockSpec((C, HIDDEN), lambda b: (0, 0)),
                pl.BlockSpec((C, 1), lambda b: (0, 0)),
                pl.BlockSpec((HIDDEN, HIDDEN), lambda b: (0, 0)),
            ],
            out_specs=pl.BlockSpec((1, C, N), lambda b: (b, 0, 0)),
        ),
        compiler_params=pltpu.CompilerParams(
            dimension_semantics=("parallel",),
            vmem_limit_bytes=_vmem_limit(
                _single_pass_vmem(C, N, jnp.dtype(out_dtype).itemsize))),
    )(xf, wqkv_bf, wout, bout, mask)


# --------------------------------------------------------------------------- #
# tiled two-phase path — used when the single-pass footprint exceeds VMEM
# --------------------------------------------------------------------------- #
def _ctx_phase_kernel(x_ref, wkv_ref, wout_ref, mask_ref, wprime_ref,
                      m_sc, s_sc, ctx_sc, *, bf16_exp):
    # grid = (B, num_tiles); tile axis is the (arbitrary) reduction axis.
    t = pl.program_id(1)

    @pl.when(t == 0)
    def _():
        m_sc[...] = jnp.full_like(m_sc, -jnp.inf)
        s_sc[...] = jnp.zeros_like(s_sc)
        ctx_sc[...] = jnp.zeros_like(ctx_sc)

    x = x_ref[0].astype(jnp.bfloat16)                                # (C, Nt)
    # fused k+v projection: one (256, C) @ (C, Nt) MXU matmul
    kv = jnp.dot(wkv_ref[...], x, preferred_element_type=jnp.float32)  # (256, Nt)
    k = kv[:HIDDEN]                                                  # (128, Nt)
    v = kv[HIDDEN:2 * HIDDEN]                                        # (128, Nt)

    # online softmax over the spatial axis (stats in f32)
    m_prev = m_sc[...]
    m_new = jnp.maximum(m_prev, jnp.max(k, axis=-1, keepdims=True))  # (128, 1)
    alpha = jnp.exp(m_prev - m_new)
    if bf16_exp:
        e_bf = jnp.exp((k - m_new).astype(jnp.bfloat16))
        e_f32 = e_bf.astype(jnp.float32)
    else:
        e_f32 = jnp.exp(k - m_new)
        e_bf = e_f32.astype(jnp.bfloat16)

    s_sc[...] = alpha * s_sc[...] + jnp.sum(e_f32, axis=-1, keepdims=True)
    ctx_tile = lax.dot_general(e_bf, v.astype(jnp.bfloat16),
                               (((1,), (1,)), ((), ())),
                               preferred_element_type=jnp.float32)   # (128, 128)
    ctx_sc[...] = alpha * ctx_sc[...] + ctx_tile
    m_sc[...] = m_new

    @pl.when(t == pl.num_programs(1) - 1)
    def _():
        ctx = ctx_sc[...] * pl.reciprocal(s_sc[...], approx=True) * mask_ref[...]
        # wprime[c, D] = sum_E wout[c, E] * ctx[D, E]
        wprime = lax.dot_general(wout_ref[...], ctx, (((1,), (1,)), ((), ())),
                                 preferred_element_type=jnp.float32)  # (C, 128)
        wprime_ref[0] = wprime.astype(wprime_ref.dtype)


def _out_phase_kernel(x_ref, wq_ref, wprime_ref, bout_ref, o_ref):
    # grid = (B, num_tiles); both axes "parallel" (independent output tiles).
    x = x_ref[0].astype(jnp.bfloat16)                                # (C, Nt)
    q = jnp.dot(wq_ref[...], x, preferred_element_type=jnp.float32)  # (128, Nt)
    out = jnp.dot(wprime_ref[0], q.astype(jnp.bfloat16),
                  preferred_element_type=jnp.float32)                # (C, Nt)
    o_ref[0] = (out + bout_ref[...]).astype(o_ref.dtype)


def _tiled_forward(xf, w_qkv, wout, bout, mask, nt, out_dtype, bf16_exp):
    B, C, N = xf.shape
    num_t = N // nt
    wkv_bf = w_qkv[HIDDEN:3 * HIDDEN].astype(jnp.bfloat16)   # (256, C)
    wq_bf = w_qkv[0:HIDDEN].astype(jnp.bfloat16)             # (128, C)

    # TODO(synk): when C >= 128, spill bf16 q tiles to an HBM scratch in phase 1
    # and re-read those in phase 2 (2*128*N bytes each way) instead of re-reading
    # f32 x (4*C*N) — cheaper HBM traffic per the review; below C=128 the x
    # re-read used here is the cheaper option.
    wprime = pl.pallas_call(
        partial(_ctx_phase_kernel, bf16_exp=bf16_exp),
        out_shape=jax.ShapeDtypeStruct((B, C, HIDDEN), jnp.bfloat16),
        grid_spec=pltpu.PrefetchScalarGridSpec(
            num_scalar_prefetch=0,
            grid=(B, num_t),
            in_specs=[
                pl.BlockSpec((1, C, nt), lambda b, t: (b, 0, t)),
                pl.BlockSpec((2 * HIDDEN, C), lambda b, t: (0, 0)),
                pl.BlockSpec((C, HIDDEN), lambda b, t: (0, 0)),
                pl.BlockSpec((HIDDEN, HIDDEN), lambda b, t: (0, 0)),
            ],
            out_specs=pl.BlockSpec((1, C, HIDDEN), lambda b, t: (b, 0, 0)),
            scratch_shapes=[
                pltpu.VMEM((HIDDEN, 1), jnp.float32),        # running max m
                pltpu.VMEM((HIDDEN, 1), jnp.float32),        # running sum s
                pltpu.VMEM((HIDDEN, HIDDEN), jnp.float32),   # running ctx
            ]),
        compiler_params=pltpu.CompilerParams(
            dimension_semantics=("parallel", "arbitrary"),
            vmem_limit_bytes=_vmem_limit(_phase1_vmem(C, nt))),
    )(xf, wkv_bf, wout, mask)

    out_flat = pl.pallas_call(
        _out_phase_kernel,
        out_shape=jax.ShapeDtypeStruct((B, C, N), out_dtype),
        grid_spec=pltpu.PrefetchScalarGridSpec(
            num_scalar_prefetch=0,
            grid=(B, num_t),
            in_specs=[
                pl.BlockSpec((1, C, nt), lambda b, t: (b, 0, t)),
                pl.BlockSpec((HIDDEN, C), lambda b, t: (0, 0)),
                pl.BlockSpec((1, C, HIDDEN), lambda b, t: (b, 0, 0)),
                pl.BlockSpec((C, 1), lambda b, t: (0, 0)),
            ],
            out_specs=pl.BlockSpec((1, C, nt), lambda b, t: (b, 0, t)),
        ),
        compiler_params=pltpu.CompilerParams(
            dimension_semantics=("parallel", "parallel"),
            vmem_limit_bytes=_vmem_limit(
                _phase2_vmem(C, nt, jnp.dtype(out_dtype).itemsize))),
    )(xf, wq_bf, wprime, bout)
    return out_flat


# --------------------------------------------------------------------------- #
# public wrapper
# --------------------------------------------------------------------------- #
def linear_attention(x, w_qkv, w_out, b_out, *, out_dtype=None, bf16_exp=False,
                     tile_n=None):
    """x: (B, C, H, W) NCHW. w_qkv: (3*128, C), w_out: (C, 128), b_out: (C,)."""
    B, C, H, W = x.shape
    N = H * W
    assert w_qkv.shape == (3 * HIDDEN, C)
    assert w_out.shape == (C, HIDDEN)
    assert b_out.shape == (C,)
    out_dtype = jnp.dtype(x.dtype) if out_dtype is None else jnp.dtype(out_dtype)

    xf = x.reshape(B, C, N)
    wout = w_out.astype(jnp.float32)
    bout = b_out.reshape(C, 1).astype(jnp.float32)
    mask = _head_mask()

    nt = _choose_tile(C, N, out_dtype.itemsize) if tile_n is None else int(tile_n)
    if nt is not None and (nt % 128 != 0 or N % nt != 0 or nt >= N):
        nt = None  # invalid / degenerate tile -> single-pass path

    if nt is None:
        out_flat = _single_pass_forward(xf, w_qkv, wout, bout, mask, out_dtype,
                                        bf16_exp)
    else:
        out_flat = _tiled_forward(xf, w_qkv, wout, bout, mask, nt, out_dtype,
                                  bf16_exp)
    return out_flat.reshape(B, C, H, W)


# --------------------------------------------------------------------------- #
# pure-JAX reference (mirrors the PyTorch forward exactly, f32 throughout)
# --------------------------------------------------------------------------- #
def _reference(x, w_qkv, w_out, b_out):
    B, C, H, W = x.shape
    N = H * W
    xf = x.reshape(B, C, N)
    qkv = jnp.einsum('oc,bcn->bon', w_qkv, xf).reshape(B, 3, HEADS, DIM_HEAD, N)
    q, k, v = qkv[:, 0], qkv[:, 1], qkv[:, 2]
    k = jax.nn.softmax(k, axis=-1)
    ctx = jnp.einsum('bhdn,bhen->bhde', k, v)
    out = jnp.einsum('bhde,bhdn->bhen', ctx, q)
    out = out.reshape(B, HEADS * DIM_HEAD, N)
    o = jnp.einsum('oc,bcn->bon', w_out, out) + b_out[None, :, None]
    return o.reshape(B, C, H, W)


if __name__ == "__main__":
    # --- small test (single-pass path): dim=4, 16x16 spatial, heads=4, dh=32 ---
    B, DIM, H, W = 2, 4, 16, 16
    key = jax.random.PRNGKey(0)
    k1, k2, k3, k4 = jax.random.split(key, 4)
    x = jax.random.normal(k1, (B, DIM, H, W), jnp.float32)
    w_qkv = jax.random.normal(k2, (3 * HIDDEN, DIM), jnp.float32) * 0.05
    w_out = jax.random.normal(k3, (DIM, HIDDEN), jnp.float32) * 0.05
    b_out = jax.random.normal(k4, (DIM,), jnp.float32) * 0.05

    out = jax.block_until_ready(linear_attention(x, w_qkv, w_out, b_out))
    ref = _reference(x, w_qkv, w_out, b_out)
    assert out.shape == (B, DIM, H, W)
    assert jnp.allclose(out, ref, atol=5e-3, rtol=5e-3), "single-pass mismatch"

    # --- exercise the tiled two-phase (flash-style) path at a modest shape ----
    B2, C2, H2, W2 = 2, 32, 32, 32          # N = 1024, forced tile of 256 lanes
    kk = jax.random.split(jax.random.PRNGKey(0), 4)
    x2 = jax.random.normal(kk[0], (B2, C2, H2, W2), jnp.float32)
    w_qkv2 = jax.random.normal(kk[1], (3 * HIDDEN, C2), jnp.float32) * 0.05
    w_out2 = jax.random.normal(kk[2], (C2, HIDDEN), jnp.float32) * 0.05
    b_out2 = jax.random.normal(kk[3], (C2,), jnp.float32) * 0.05

    out2 = jax.block_until_ready(
        linear_attention(x2, w_qkv2, w_out2, b_out2, tile_n=256))
    ref2 = _reference(x2, w_qkv2, w_out2, b_out2)
    assert out2.shape == (B2, C2, H2, W2)
    assert jnp.allclose(out2, ref2, atol=1e-2, rtol=1e-2), "tiled mismatch"

    print("KERNEL_OK")
</pallas_src>

<mosaic_0001>
module attributes {stable_mosaic.version = 11 : i64} {
  func.func @_single_pass_kernel(%arg0: i32, %arg1: memref<1x4x256xf32, #tpu.memory_space<vmem>>, %arg2: memref<384x4xbf16, #tpu.memory_space<vmem>>, %arg3: memref<4x128xf32, #tpu.memory_space<vmem>>, %arg4: memref<4x1xf32, #tpu.memory_space<vmem>>, %arg5: memref<128x128xf32, #tpu.memory_space<vmem>>, %arg6: memref<1x4x256xf32, #tpu.memory_space<vmem>>) attributes {dimension_semantics = [#tpu.dimension_semantics<parallel>], iteration_bounds = array<i64: 2>, scalar_prefetch = 0 : i64, scratch_operands = 0 : i64, tpu.core_type = #tpu.core_type<tc>, window_params = [{transform_indices = @transform_0, window_bounds = array<i64: 1, 4, 256>}, {pipeline_mode = #tpu.pipeline_mode<synchronous>, transform_indices = @transform_1, window_bounds = array<i64: 384, 4>}, {pipeline_mode = #tpu.pipeline_mode<synchronous>, transform_indices = @transform_2, window_bounds = array<i64: 4, 128>}, {pipeline_mode = #tpu.pipeline_mode<synchronous>, transform_indices = @transform_3, window_bounds = array<i64: 4, 1>}, {pipeline_mode = #tpu.pipeline_mode<synchronous>, transform_indices = @transform_4, window_bounds = array<i64: 128, 128>}, {transform_indices = @transform_5, window_bounds = array<i64: 1, 4, 256>}]} {
    %c0 = arith.constant 0 : index
    %c0_0 = arith.constant 0 : index
    %c0_1 = arith.constant 0 : index
    %0 = vector.load %arg1[%c0, %c0_0, %c0_1] : memref<1x4x256xf32, #tpu.memory_space<vmem>>, vector<1x4x256xf32>
    %1 = vector.shape_cast %0 : vector<1x4x256xf32> to vector<4x256xf32>
    %2 = arith.truncf %1 : vector<4x256xf32> to vector<4x256xbf16>
    %c128 = arith.constant 128 : index
    %c0_2 = arith.constant 0 : index
    %3 = vector.load %arg2[%c128, %c0_2] : memref<384x4xbf16, #tpu.memory_space<vmem>>, vector<128x4xbf16>
    %cst = arith.constant dense<0.000000e+00> : vector<128x256xf32>
    %4 = tpu.matmul %3, %2, %cst {dimension_numbers = #tpu.dot_dimension_numbers<[1], [0], [0], [1], [0, 0, 1, 1], [], []>} : vector<128x4xbf16>, vector<4x256xbf16>, vector<128x256xf32> -> vector<128x256xf32>
    %cst_3 = arith.constant dense<0xFF800000> : vector<128xf32>
    %5 = vector.multi_reduction <maximumf>, %4, %cst_3 [1] : vector<128x256xf32> to vector<128xf32>
    %6 = vector.shape_cast %5 : vector<128xf32> to vector<128x1xf32>
    %7 = vector.broadcast %6 : vector<128x1xf32> to vector<128x256xf32>
    %8 = arith.subf %4, %7 : vector<128x256xf32>
    %9 = math.exp %8 : vector<128x256xf32>
    %10 = arith.truncf %9 : vector<128x256xf32> to vector<128x256xbf16>
    %cst_4 = arith.constant dense<0.000000e+00> : vector<128xf32>
    %11 = vector.multi_reduction <add>, %9, %cst_4 [1] : vector<128x256xf32> to vector<128xf32>
    %12 = vector.shape_cast %11 : vector<128xf32> to vector<128x1xf32>
    %c256 = arith.constant 256 : index
    %c0_5 = arith.constant 0 : index
    %13 = vector.load %arg2[%c256, %c0_5] : memref<384x4xbf16, #tpu.memory_space<vmem>>, vector<128x4xbf16>
    %cst_6 = arith.constant dense<0.000000e+00> : vector<128x256xf32>
    %14 = tpu.matmul %13, %2, %cst_6 {dimension_numbers = #tpu.dot_dimension_numbers<[1], [0], [0], [1], [0, 0, 1, 1], [], []>} : vector<128x4xbf16>, vector<4x256xbf16>, vector<128x256xf32> -> vector<128x256xf32>
    %15 = arith.truncf %14 : vector<128x256xf32> to vector<128x256xbf16>
    %cst_7 = arith.constant dense<0.000000e+00> : vector<128x128xf32>
    %16 = tpu.matmul %10, %15, %cst_7 {dimension_numbers = #tpu.dot_dimension_numbers<[1], [1], [0], [0], [0, 0, 1, 0], [], []>} : vector<128x256xbf16>, vector<128x256xbf16>, vector<128x128xf32> -> vector<128x128xf32>
    %17 = tpu.reciprocal %12 {approx = true} : vector<128x1xf32> -> vector<128x1xf32>
    %18 = vector.broadcast %17 : vector<128x1xf32> to vector<128x128xf32>
    %19 = arith.mulf %16, %18 : vector<128x128xf32>
    %c0_8 = arith.constant 0 : index
    %c0_9 = arith.constant 0 : index
    %20 = vector.load %arg5[%c0_8, %c0_9] : memref<128x128xf32, #tpu.memory_space<vmem>>, vector<128x128xf32>
    %21 = arith.mulf %19, %20 : vector<128x128xf32>
    %c0_10 = arith.constant 0 : index
    %c0_11 = arith.constant 0 : index
    %22 = vector.load %arg3[%c0_10, %c0_11] : memref<4x128xf32, #tpu.memory_space<vmem>>, vector<4x128xf32>
    %cst_12 = arith.constant dense<0.000000e+00> : vector<4x128xf32>
    %23 = tpu.matmul %22, %21, %cst_12 {dimension_numbers = #tpu.dot_dimension_numbers<[1], [1], [0], [0], [0, 0, 1, 0], [], []>} : vector<4x128xf32>, vector<128x128xf32>, vector<4x128xf32> -> vector<4x128xf32>
    %c0_13 = arith.constant 0 : index
    %c0_14 = arith.constant 0 : index
    %24 = vector.load %arg2[%c0_13, %c0_14] : memref<384x4xbf16, #tpu.memory_space<vmem>>, vector<128x4xbf16>
    %cst_15 = arith.constant dense<0.000000e+00> : vector<128x256xf32>
    %25 = tpu.matmul %24, %2, %cst_15 {dimension_numbers = #tpu.dot_dimension_numbers<[1], [0], [0], [1], [0, 0, 1, 1], [], []>} : vector<128x4xbf16>, vector<4x256xbf16>, vector<128x256xf32> -> vector<128x256xf32>
    %26 = arith.truncf %23 : vector<4x128xf32> to vector<4x128xbf16>
    %27 = arith.truncf %25 : vector<128x256xf32> to vector<128x256xbf16>
    %cst_16 = arith.constant dense<0.000000e+00> : vector<4x256xf32>
    %28 = tpu.matmul %26, %27, %cst_16 {dimension_numbers = #tpu.dot_dimension_numbers<[1], [0], [0], [1], [0, 0, 1, 1], [], []>} : vector<4x128xbf16>, vector<128x256xbf16>, vector<4x256xf32> -> vector<4x256xf32>
    %c0_17 = arith.constant 0 : index
    %c0_18 = arith.constant 0 : index
    %29 = vector.load %arg4[%c0_17, %c0_18] : memref<4x1xf32, #tpu.memory_space<vmem>>, vector<4x1xf32>
    %30 = vector.broadcast %29 : vector<4x1xf32> to vector<4x256xf32>
    %31 = arith.addf %28, %30 : vector<4x256xf32>
    %c0_19 = arith.constant 0 : index
    %c0_20 = arith.constant 0 : index
    %c0_21 = arith.constant 0 : index
    %32 = vector.load %arg6[%c0_19, %c0_20, %c0_21] : memref<1x4x256xf32, #tpu.memory_space<vmem>>, vector<1x4x256xf32>
    %33 = vector.shape_cast %32 : vector<1x4x256xf32> to vector<4x256xf32>
    %34 = vector.shape_cast %31 : vector<4x256xf32> to vector<1x4x256xf32>
    tpu.vector_store %arg6[%c0_19, %c0_20, %c0_21], %34 {strides = array<i32>} : memref<1x4x256xf32, #tpu.memory_space<vmem>>, vector<1x4x256xf32>,
    return
  }
  func.func @transform_0(%arg0: i32) -> (i32, i32, i32) {
    %c0_i32 = arith.constant 0 : i32
    %c0_i32_0 = arith.constant 0 : i32
    %c0_i32_1 = arith.constant 0 : i32
    return %arg0, %c0_i32, %c0_i32_0 : i32, i32, i32
  }
  func.func @transform_1(%arg0: i32) -> (i32, i32) {
    %c0_i32 = arith.constant 0 : i32
    %c0_i32_0 = arith.constant 0 : i32
    %c0_i32_1 = arith.constant 0 : i32
    return %c0_i32, %c0_i32_0 : i32, i32
  }
  func.func @transform_2(%arg0: i32) -> (i32, i32) {
    %c0_i32 = arith.constant 0 : i32
    %c0_i32_0 = arith.constant 0 : i32
    %c0_i32_1 = arith.constant 0 : i32
    return %c0_i32, %c0_i32_0 : i32, i32
  }
  func.func @transform_3(%arg0: i32) -> (i32, i32) {
    %c0_i32 = arith.constant 0 : i32
    %c0_i32_0 = arith.constant 0 : i32
    %c0_i32_1 = arith.constant 0 : i32
    return %c0_i32, %c0_i32_0 : i32, i32
  }
  func.func @transform_4(%arg0: i32) -> (i32, i32) {
    %c0_i32 = arith.constant 0 : i32
    %c0_i32_0 = arith.constant 0 : i32
    %c0_i32_1 = arith.constant 0 : i32
    return %c0_i32, %c0_i32_0 : i32, i32
  }
  func.func @transform_5(%arg0: i32) -> (i32, i32, i32) {
    %c0_i32 = arith.constant 0 : i32
    %c0_i32_0 = arith.constant 0 : i32
    %c0_i32_1 = arith.constant 0 : i32
    return %arg0, %c0_i32, %c0_i32_0 : i32, i32, i32
  }
}

</mosaic_0001>

<bundles_post_ra>
// kernel: tpu_custom_call.1
= control target key start
LH: loop header
LB: loop body
LE: loop exit
PB: predicated region body
PF: predicated region fallthrough
CT: control target
= control target key end

     0   :  { %10 = vsyncpa [#allocation3], 0  ;;  %s2380_s0 = inlined_call_operand.vmem [shape: f32[2,4,256], index: 0, kind: input, shape index: {}]   ;;  %s2381_s1 = inlined_call_operand.vmem [shape: bf16[384,4], index: 1, kind: input, shape index: {}]   ;;  %s2382_s2 = inlined_call_operand.vmem [shape: f32[4,128], index: 2, kind: input, shape index: {}]   ;;  %s2383_s3 = inlined_call_operand.vmem [shape: f32[4,1], index: 3, kind: input, shape index: {}]   ;;  %s2384_s4 = inlined_call_operand.vmem [shape: f32[128,128], index: 4, kind: input, shape index: {}]   ;;  %s2385_s5 = inlined_call_operand.hbm [shape: f32[2,4,256], index: 5, kind: output, shape index: {}]  }
   0x1   :  { %12 = vsyncpa [#allocation3 + $0x1], 0  ;;  %s1793_s18 = smov 0   ;;  %s1795_s19 = smov 0  }
   0x2   :  { %s1797_s20 = smov 0   ;;  %s1799_s21 = smov 0  }
   0x3 LB: > { %s1814_s22 = sadd.s32 4294967295, %s1757_s21   ;;  %s1416_s23 = sadd.s32 4294967294, %s1757_s21   ;;  %s1757_s21 = sphi %s1799_s21, %s2434_s21   ;;  %s1753_s20 = sphi %s1797_s20, %s2433_s20   ;;  %s1749_s19 = sphi %s1795_s19, %s2432_s19   ;;  %s1745_s18 = sphi %s1793_s18, %s2431_s18  }
   0x4   : > { %s1818_s24 = sadd.s32 1, %s1757_s21   ;;  %s135_s25 = sadd.s32 1, %s1753_s20 }
   0x5   : > { %s132_s26 = ssub.s32 %s1757_s21, %s1818_s24  ;;  %p145_p0 = scmp.ne.s32.totalorder %s1753_s20, %s1749_s19 }
   0x6   : > { %p133_p1 = scmp.eq.s32.totalorder %s132_s26, 0  ;;  %p146_p2 = scmp.eq.s32.totalorder %s1814_s22, 1 }
   0x7   : > { %p151_p3 = scmp.ne.s32.totalorder %s1749_s19, %s1745_s18  ;;  %p152_p4 = scmp.eq.s32.totalorder %s1416_s23, 1 }
   0x8   : > { %s1829_s27 = scalar_select %p133_p1, %s1753_s20, %s135_s25  }
   0x9   : > { %p1831_p5 = por %p146_p2, %p145_p0  ;;  %p1835_p6 = por %p152_p4, %p151_p3 }
   0xa   : > { %p1419_p7 = scmp.ge.s32.totalorder %s1757_s21, 1  ;;  %p190_p8 = scmp.lt.s32.totalorder %s1757_s21, 3 }
   0xc   : > { %p191_p9 = pnand %p1419_p7, %p190_p8 }
   0xe   : > { %194 = sbr.rel (%p191_p9) target bundleno = 1220 (0x4c4), region = 40 }
  0x13   : > { %p218_p10 = scmp.lt.s32.totalorder %s1814_s22, 1  ;;  %v2386_v0 = vmov 0   ;;  %vm311_vm0 = vcmask 1041408   ;;  %v1577_v6 = vld [vmem:[%s2381_s1 + $0x40] sm:$0xff]   ;;  %vm286_vm1 = vcmask 31744   ;;  %v1579_v8 = vld [vmem:[%s2381_s1 + $0x48] sm:$0xff]  }
  0x14   : > { %350 = vmatprep.mubr.bf16.mxu0 %v2386_v0  ;;  %751 = vmatprep.mubr.bf16.mxu1 %v2386_v0  ;;  %v1578_v7 = vld [vmem:[%s2381_s1 + $0x80] sm:$0xff]   ;;  %v1580_v9 = vld [vmem:[%s2381_s1 + $0x88] sm:$0xff]   ;;  %v1581_v10 = vld [vmem:[%s2381_s1 + $0x50] sm:$0xff]   ;;  %vm1761_vm2 = vmmov 0   ;;  %s215_s14 = sand.u32 1, %s1749_s19   ;;  %s1480_s16 = sshll.u32 %s1814_s22, 7 }
  0x15   : > { %s219_s30 = scalar_select %p218_p10, %s1814_s22, 1  ;;  %1575 = vset.pattern.permute.xlu0 %v2386_v0  ;;  %v1582_v11 = vld [vmem:[%s2381_s1 + $0x90] sm:$0xff]   ;;  %v1583_v12 = vld [vmem:[%s2381_s1 + $0x58] sm:$0xff]   ;;  %v1585_v14 = vld [vmem:[%s2381_s1 + $0x60] sm:$0xff]  }
  0x16   : > { %v1584_v13 = vld [vmem:[%s2381_s1 + $0x98] sm:$0xff]   ;;  %v1586_v15 = vld [vmem:[%s2381_s1 + $0xa0] sm:$0xff]   ;;  %v1587_v16 = vld [vmem:[%s2381_s1 + $0x68] sm:$0xff]   ;;  %s1420_s15 = sshll.u32 %s215_s14, 3  ;;  %s1762_s22 = smov [#allocation2]  }
  0x17   : > { %s1479_s6 = sshll.u32 %s219_s30, 3  ;;  %v1588_v17 = vld [vmem:[%s2381_s1 + $0xa8] sm:$0xff]   ;;  %v1589_v18 = vld [vmem:[%s2381_s1 + $0x70] sm:$0xff]   ;;  %v1591_v20 = vld [vmem:[%s2381_s1 + $0x78] sm:$0xff]   ;;  %s217_s17 = scalar_lea.vmem [#allocation2], %s1420_s15 }
  0x18   : > { %s222_s9 = scalar_lea.vmem %s2380_s0, %s1479_s6  ;;  %v1590_v19 = vld [vmem:[%s2381_s1 + $0xb0] sm:$0xff]   ;;  %v1592_v21 = vld [vmem:[%s2381_s1 + $0xb8] sm:$0xff]   ;;  %s1357_s23 = sshll.u32 %s217_s17, 4  ;;  %s1358_s23 = int_to_ptr.vmem [resolvable:$true] %s1357_s23 }
  0x19   : > { %v224_v1 = vld [vmem:[%s222_s9] sm:$0xff]  ;;  %s2345_s30 = scalar_lea.hbm %s2385_s5, %s1480_s16  ;;  %s1343_s6 = scalar_lea.sflag [#allocation3], %s215_s14 }
  0x1a   : > { %v226_v2 = vcombine.high %v224_v1, %v224_v1  ;;  %v228_v3 = vpack.c.bf16 %v224_v1, %v224_v1  ;;  %s1697_s7 = scalar_lea.vmem %s1358_s23, 128  ;;  %s1701_s8 = sshll.u32 %s1762_s22, 4  ;;  %s1702_s8 = int_to_ptr.vmem [resolvable:$false] %s1701_s8 }
  0x1b   : > { %p1698_p11 = scmp.ne.s32.totalorder %s1358_s23, %s1697_s7  ;;  %s1703_s9 = scalar_lea.vmem %s1702_s8, 256 }
  0x1c   : > { %v1849_v4 = vpack.c.bf16 %v226_v2, %v226_v2  ;;  %v1852_v5 = vsel %vm311_vm0, %v228_v3, 0  ;;  %p1704_p0 = scmp.lt.s32.totalorder %s1358_s23, %s1702_s8  ;;  %p1705_p1 = scmp.lt.s32.totalorder %s1703_s9, %s1697_s7 }
  0x1d   : > { %2402 = vst [vmem:[#allocation6_spill] sm:$0xff] %v1852_v5  ;;  %p1699_p12 = pnand %p1698_p11, %p1831_p5 }
  0x1e   : > { %2401 = vst [vmem:[#allocation5_spill] sm:$0xff] %v1849_v4  ;;  %1431 = vmatprep.subr.msk.bf16.mxu0 %vm311_vm0, %v1849_v4  ;;  %1448 = vmatprep.subr.msk.bf16.mxu1 %vm311_vm0, %v1849_v4  ;;  %p1706_p2 = por %p1705_p1, %p1704_p0 }
  0x1f   : > { %333 = vmatpush1.bf16.msra.mxu0 %v1852_v5  ;;  %734 = vmatpush1.bf16.msra.mxu1 %v1852_v5  ;;  %p1700_p13 = pneg %p1699_p12 }
  0x21   : > { %p1707_p3 = pnand %p1706_p2, %p1700_p13 }
  0x22   : > { %1432 = vmatmul.mubr.msk.bf16.vlgmr.msra.gmra.mxu0 %vm286_vm1, %v1577_v6  ;;  %1449 = vmatmul.mubr.msk.bf16.vlgmr.msra.gmra.mxu1 %vm286_vm1, %v1578_v7 }
  0x23   : > { %360 = vmatprep.mubr.bf16.mxu0 %v2386_v0  ;;  %761 = vmatprep.mubr.bf16.mxu1 %v2386_v0 }
  0x2a   : > { %1433 = vmatmul.mubr.msk.bf16.gmra.mxu0 %vm286_vm1, %v1579_v8  ;;  %1450 = vmatmul.mubr.msk.bf16.gmra.mxu1 %vm286_vm1, %v1580_v9 }
  0x2b   : > { %370 = vmatprep.mubr.bf16.mxu0 %v2386_v0  ;;  %771 = vmatprep.mubr.bf16.mxu1 %v2386_v0 }
  0x32   : > { %1434 = vmatmul.mubr.msk.bf16.gmra.mxu0 %vm286_vm1, %v1581_v10  ;;  %1451 = vmatmul.mubr.msk.bf16.gmra.mxu1 %vm286_vm1, %v1582_v11 }
  0x33   : > { %380 = vmatprep.mubr.bf16.mxu0 %v2386_v0  ;;  %781 = vmatprep.mubr.bf16.mxu1 %v2386_v0 }
  0x3a   : > { %1435 = vmatmul.mubr.msk.bf16.gmra.mxu0 %vm286_vm1, %v1583_v12  ;;  %1452 = vmatmul.mubr.msk.bf16.gmra.mxu1 %vm286_vm1, %v1584_v13 }
  0x3b   : > { %390 = vmatprep.mubr.bf16.mxu0 %v2386_v0  ;;  %791 = vmatprep.mubr.bf16.mxu1 %v2386_v0 }
  0x42   : > { %1436 = vmatmul.mubr.msk.bf16.gmra.mxu0 %vm286_vm1, %v1585_v14  ;;  %1453 = vmatmul.mubr.msk.bf16.gmra.mxu1 %vm286_vm1, %v1586_v15 }
  0x43   : > { %400 = vmatprep.mubr.bf16.mxu0 %v2386_v0  ;;  %801 = vmatprep.mubr.bf16.mxu1 %v2386_v0 }
  0x4a   : > { %1437 = vmatmul.mubr.msk.bf16.gmra.mxu0 %vm286_vm1, %v1587_v16  ;;  %1454 = vmatmul.mubr.msk.bf16.gmra.mxu1 %vm286_vm1, %v1588_v17 }
  0x4b   : > { %410 = vmatprep.mubr.bf16.mxu0 %v2386_v0  ;;  %811 = vmatprep.mubr.bf16.mxu1 %v2386_v0 }
  0x52   : > { %1438 = vmatmul.mubr.msk.bf16.gmra.mxu0 %vm286_vm1, %v1589_v18  ;;  %1455 = vmatmul.mubr.msk.bf16.gmra.mxu1 %vm286_vm1, %v1590_v19 }
  0x53   : > { %420 = vmatprep.mubr.bf16.mxu0 %v2386_v0  ;;  %821 = vmatprep.mubr.bf16.mxu1 %v2386_v0 }
  0x5a   : > { %1439 = vmatmul.mubr.msk.bf16.gmra.mxu0 %vm286_vm1, %v1591_v20  ;;  %1456 = vmatmul.mubr.msk.bf16.gmra.mxu1 %vm286_vm1, %v1592_v21 }
  0xe2   : > { %v1938_v22 = vpop.f32.mrf.mxu0  ;;  %v1940_v23 = vpop.f32.mrf.mxu1 }
  0xe4   : > { %v1942_v24 = vpop.f32.mrf.mxu0  ;;  %v1944_v25 = vpop.f32.mrf.mxu1 }
  0xe5   : > { %v431_v26 = vmax.f32 %v1938_v22, %v1942_v24 }
  0xe6   : > { %v1948_v27 = vpop.f32.mrf.mxu0  ;;  %v1950_v28 = vpop.f32.mrf.mxu1 }
  0xe7   : > { %432 = vmax.xlane.f32.xlu0 %v431_v26 }
  0xe8   : > { %v1954_v30 = vpop.f32.mrf.mxu0  ;;  %v1956_v31 = vpop.f32.mrf.mxu1 }
  0xe9   : > { %v434_v33 = vmax.f32 %v1948_v27, %v1954_v30 }
  0xea   : > { %v1962_v34 = vpop.f32.mrf.mxu0  ;;  %v1964_v35 = vpop.f32.mrf.mxu1 }
  0xeb   : > { %435 = vmax.xlane.f32.xlu0 %v434_v33 }
  0xec   : > { %v1966_v36 = vpop.f32.mrf.mxu0  ;;  %v1968_v37 = vpop.f32.mrf.mxu1 }
  0xed   : > { %v437_v38 = vmax.f32 %v1962_v34, %v1966_v36 }
  0xee   : > { %v1972_v39 = vpop.f32.mrf.mxu0  ;;  %v1974_v40 = vpop.f32.mrf.mxu1 }
  0xef   : > { %438 = vmax.xlane.f32.xlu1 %v437_v38 }
  0xf0   : > { %v1978_v42 = vpop.f32.mrf.mxu0  ;;  %v1980_v43 = vpop.f32.mrf.mxu1 }
  0xf1   : > { %v440_v45 = vmax.f32 %v1972_v39, %v1978_v42 }
  0xf2   : > { %v1986_v46 = vpop.f32.mrf.mxu0  ;;  %v1988_v47 = vpop.f32.mrf.mxu1 }
  0xf3   : > { %441 = vmax.xlane.f32.xlu1 %v440_v45 }
  0xf4   : > { %v1990_v48 = vpop.f32.mrf.mxu0  ;;  %v1992_v49 = vpop.f32.mrf.mxu1 }
  0xf5   : > { %v443_v50 = vmax.f32 %v1986_v46, %v1990_v48 }
  0xf6   : > { %v1996_v51 = vpop.f32.mrf.mxu0  ;;  %v1998_v52 = vpop.f32.mrf.mxu1 }
  0xf7   : > { %444 = vmax.xlane.f32.xlu0 %v443_v50 }
  0xf8   : > { %v2002_v54 = vpop.f32.mrf.mxu0  ;;  %v2004_v55 = vpop.f32.mrf.mxu1 }
  0xf9   : > { %v446_v57 = vmax.f32 %v1996_v51, %v2002_v54 }
  0xfa   : > { %v2010_v58 = vpop.f32.mrf.mxu0  ;;  %v2012_v59 = vpop.f32.mrf.mxu1 }
  0xfb   : > { %447 = vmax.xlane.f32.xlu1 %v446_v57 }
  0xfc   : > { %v2014_v60 = vpop.f32.mrf.mxu0  ;;  %v2016_v61 = vpop.f32.mrf.mxu1 }
  0xfd   : > { %v449_v62 = vmax.f32 %v2010_v58, %v2014_v60 }
  0xfe   : > { %v2020_v63 = vpop.f32.mrf.mxu0  ;;  %v2022_v1 = vpop.f32.mrf.mxu1 }
  0xff   : > { %450 = vmax.xlane.f32.xlu0 %v449_v62 }
 0x100   : > { %v2026_v3 = vpop.f32.mrf.mxu0  ;;  %v2028_v6 = vpop.f32.mrf.mxu1 }
 0x101   : > { %v452_v7 = vmax.f32 %v2020_v63, %v2026_v3 }
 0x102   : > { %v2032_v8 = vpop.f32.mrf.mxu0  ;;  %v2034_v9 = vpop.f32.mrf.mxu1 }
 0x103   : > { %453 = vmax.xlane.f32.xlu1 %v452_v7 }
 0x104   : > { %v2036_v10 = vpop.f32.mrf.mxu0  ;;  %v795_v11 = vpop.f32.mrf.mxu1 }
 0x105   : > { %v455_v12 = vmax.f32 %v2032_v8, %v2036_v10 }
 0x106   : > { %v2040_v13 = vpop.f32.mrf.mxu0  ;;  %v797_v14 = vpop.f32.mrf.mxu1 }
 0x107   : > { %456 = vmax.xlane.f32.xlu0 %v455_v12 }
 0x108   : > { %v2042_v15 = vpop.f32.mrf.mxu0  ;;  %v799_v16 = vpop.f32.mrf.mxu1 }
 0x109   : > { %v458_v17 = vmax.f32 %v2040_v13, %v2042_v15 }
 0x10a   : > { %v2046_v18 = vpop.f32.mrf.mxu0  ;;  %v803_v19 = vpop.f32.mrf.mxu1 }
 0x10b   : > { %459 = vmax.xlane.f32.xlu1 %v458_v17 }
 0x10c   : > { %v2048_v20 = vpop.f32.mrf.mxu0  ;;  %v805_v21 = vpop.f32.mrf.mxu1 }
 0x10d   : > { %2403 = vst [vmem:[#allocation7_spill] sm:$0xff] %v2048_v20  ;;  %v461_v26 = vmax.f32 %v2046_v18, %v2048_v20 }
 0x10e   : > { %v2052_v33 = vpop.f32.mrf.mxu0  ;;  %v807_v38 = vpop.f32.mrf.mxu1 }
 0x10f   : > { %2404 = vst [vmem:[#allocation8_spill] sm:$0xff] %v2052_v33  ;;  %462 = vmax.xlane.f32.xlu0 %v461_v26 }
 0x110   : > { %v2054_v45 = vpop.f32.mrf.mxu0  ;;  %v809_v50 = vpop.f32.mrf.mxu1 }
 0x111   : > { %2405 = vst [vmem:[#allocation9_spill] sm:$0xff] %v2054_v45  ;;  %v464_v57 = vmax.f32 %v2052_v33, %v2054_v45  ;;  %v843_v20 = vpack.c.bf16 %v809_v50, %v805_v21 }
 0x112   : > { %v2058_v62 = vpop.f32.mrf.mxu0  ;;  %v813_v7 = vpop.f32.mrf.mxu1 }
 0x113   : > { %2406 = vst [vmem:[#allocation10_spill] sm:$0xff] %v2058_v62  ;;  %465 = vmax.xlane.f32.xlu1 %v464_v57 }
 0x114   : > { %v2060_v12 = vpop.f32.mrf.mxu0  ;;  %v815_v17 = vpop.f32.mrf.mxu1 }
 0x115   : > { %2407 = vst [vmem:[#allocation11_spill] sm:$0xff] %v2060_v12  ;;  %v467_v0 = vmax.f32 %v2058_v62, %v2060_v12 }
 0x116   : > { %v2064_v29 = vpop.f32.mrf.mxu0  ;;  %v817_v32 = vpop.f32.mrf.mxu1 }
 0x117   : > { %2408 = vst [vmem:[#allocation12_spill] sm:$0xff] %v2064_v29  ;;  %468 = vmax.xlane.f32.xlu0 %v467_v0 }
 0x118   : > { %v2066_v26 = vpop.f32.mrf.mxu0  ;;  %v819_v41 = vpop.f32.mrf.mxu1 }
 0x119   : > { %2409 = vst [vmem:[#allocation13_spill] sm:$0xff] %v2066_v26  ;;  %v470_v44 = vmax.f32 %v2064_v29, %v2066_v26  ;;  %v845_v33 = vpack.c.bf16 %v819_v41, %v815_v17  ;;  %v839_v41 = vpack.c.bf16 %v2028_v6, %v2016_v61  ;;  %v2416_v61 = vpack.c.bf16 %v1974_v40, %v1964_v35 }
 0x11a   : > { %v2070_v53 = vpop.f32.mrf.mxu0  ;;  %v823_v56 = vpop.f32.mrf.mxu1 }
 0x11b   : > { %2410 = vst [vmem:[#allocation14_spill] sm:$0xff] %v2070_v53  ;;  %471 = vmax.xlane.f32.xlu1 %v470_v44  ;;  %v844_v44 = vpack.c.bf16 %v817_v32, %v813_v7  ;;  %v2413_v32 = vpack.c.bf16 %v2004_v55, %v1992_v49  ;;  %v2418_v49 = vpack.c.bf16 %v1950_v28, %v1940_v23 }
 0x11c   : > { %v2072_v57 = vpop.f32.mrf.mxu0  ;;  %v825_v2 = vpop.f32.mrf.mxu1 }
 0x11d   : > { %2411 = vst [vmem:[#allocation15_spill] sm:$0xff] %v2072_v57  ;;  %v473_v5 = vmax.f32 %v2070_v53, %v2072_v57  ;;  %v842_v57 = vpack.c.bf16 %v807_v38, %v803_v19  ;;  %v841_v53 = vpack.c.bf16 %v799_v16, %v795_v11 }
 0x11e   : > { %v2076_v4 = vpop.f32.mrf.mxu0  ;;  %v827_v12 = vpop.f32.mrf.mxu1 }
 0x11f   : > { %474 = vmax.xlane.f32.xlu0 %v473_v5  ;;  %v846_v0 = vpack.c.bf16 %v827_v12, %v823_v56  ;;  %v840_v5 = vpack.c.bf16 %v797_v14, %v2034_v9  ;;  %v2414_v56 = vpack.c.bf16 %v1998_v52, %v1988_v47 }
 0x120   : > { %v2078_v62 = vpop.f32.mrf.mxu0  ;;  %v829_v45 = vpop.f32.mrf.mxu1 }
 0x121   : > { %v847_v26 = vpack.c.bf16 %v829_v45, %v825_v2  ;;  %v476_v29 = vmax.f32 %v2076_v4, %v2078_v62 }
 0x123   : > { %848 = vmatprep.subr.bf16.mxu0 %v847_v26  ;;  %477 = vmax.xlane.f32.xlu1 %v476_v29  ;;  %v2412_v29 = vpack.c.bf16 %v2022_v1, %v2012_v59  ;;  %v2417_v59 = vpack.c.bf16 %v1956_v31, %v1944_v25 }
 0x124   : > { %849 = vmatpush1.bf16.xpose.msra.mxu0 %v846_v0 }
 0x125   : > { %850 = vmatprep.subr.bf16.mxu0 %v845_v33 }
 0x12c   : > { %851 = vmatpush1.bf16.xpose.msra.mxu0 %v844_v44 }
 0x12d   : > { %852 = vmatprep.subr.bf16.mxu0 %v843_v20 }
 0x134   : > { %853 = vmatpush1.bf16.xpose.msra.mxu0 %v842_v57 }
 0x135   : > { %854 = vmatprep.subr.bf16.mxu0 %v841_v53  ;;  %v2415_v53 = vpack.c.bf16 %v1980_v43, %v1968_v37 }
 0x13c   : > { %855 = vmatpush1.bf16.xpose.msra.mxu0 %v840_v5 }
 0x13d   : > { %856 = vmatprep.subr.bf16.mxu0 %v839_v41 }
 0x144   : > { %857 = vmatpush1.bf16.xpose.msra.mxu0 %v2412_v29 }
 0x145   : > { %858 = vmatprep.subr.bf16.mxu0 %v2413_v32 }
 0x14c   : > { %859 = vmatpush1.bf16.xpose.msra.mxu0 %v2414_v56 }
 0x14d   : > { %860 = vmatprep.subr.bf16.mxu0 %v2415_v53 }
 0x154   : > { %861 = vmatpush1.bf16.xpose.msra.mxu0 %v2416_v61 }
 0x155   : > { %862 = vmatprep.subr.bf16.mxu0 %v2417_v59 }
 0x15c   : > { %863 = vmatpush1.bf16.xpose.msra.mxu0 %v2418_v49 }
 0x170   : > { %v433_v55 = vpop.xlane.xlu0 %432 }
 0x171   : > { %v479_v47 = vsub.f32 %v1938_v22, %v433_v55  ;;  %v480_v52 = vsub.f32 %v1942_v24, %v433_v55 }
 0x173   : > { %v511_v1 = vmul.f32 1.442695, %v479_v47  ;;  %v513_v37 = vmul.f32 1.442695, %v480_v52 }
 0x174   : > { %v436_v43 = vpop.xlane.xlu0 %435 }
 0x175   : > { %1601 = vpow2.f32 %v511_v1  ;;  %v481_v35 = vsub.f32 %v1948_v27, %v436_v43  ;;  %v482_v40 = vsub.f32 %v1954_v30, %v436_v43 }
 0x176   : > { %1603 = vpow2.f32 %v513_v37 }
 0x177   : > { %v515_v25 = vmul.f32 1.442695, %v481_v35  ;;  %v517_v31 = vmul.f32 1.442695, %v482_v40 }
 0x178   : > { %v439_v2 = vpop.xlane.xlu1 %438 }
 0x179   : > { %1605 = vpow2.f32 %v515_v25  ;;  %v483_v23 = vsub.f32 %v1962_v34, %v439_v2  ;;  %v484_v28 = vsub.f32 %v1966_v36, %v439_v2 }
 0x17a   : > { %1607 = vpow2.f32 %v517_v31 }
 0x17b   : > { %v519_v22 = vmul.f32 1.442695, %v483_v23  ;;  %v521_v24 = vmul.f32 1.442695, %v484_v28 }
 0x17c   : > { %v442_v6 = vpop.xlane.xlu1 %441 }
 0x17d   : > { %1609 = vpow2.f32 %v519_v22  ;;  %v485_v9 = vsub.f32 %v1972_v39, %v442_v6  ;;  %v486_v27 = vsub.f32 %v1978_v42, %v442_v6 }
 0x17e   : > { %1611 = vpow2.f32 %v521_v24 }
 0x17f   : > { %v523_v30 = vmul.f32 1.442695, %v485_v9  ;;  %v525_v11 = vmul.f32 1.442695, %v486_v27  ;;  %v2419_v27 = vld [vmem:[#allocation7_spill] sm:$0xff] }
 0x180   : > { %v445_v14 = vpop.xlane.xlu0 %444 }
 0x181   : > { %1613 = vpow2.f32 %v523_v30  ;;  %v487_v16 = vsub.f32 %v1986_v46, %v445_v14  ;;  %v488_v34 = vsub.f32 %v1990_v48, %v445_v14 }
 0x182   : > { %v1602_v19 = vpop.eup %1601  ;;  %1615 = vpow2.f32 %v525_v11 }
 0x183   : > { %v1604_v36 = vpop.eup %1603  ;;  %v527_v20 = vmul.f32 1.442695, %v487_v16  ;;  %v529_v21 = vmul.f32 1.442695, %v488_v34  ;;  %v2420_v34 = vld [vmem:[#allocation8_spill] sm:$0xff] }
 0x184   : > { %v448_v33 = vpop.xlane.xlu1 %447  ;;  %v2116_v38 = vadd.f32 %v1604_v36, %v1602_v19 }
 0x185   : > { %1617 = vpow2.f32 %v527_v20  ;;  %v489_v39 = vsub.f32 %v1996_v51, %v448_v33  ;;  %v490_v42 = vsub.f32 %v2002_v54, %v448_v33 }
 0x186   : > { %v1606_v45 = vpop.eup %1605  ;;  %1619 = vpow2.f32 %v529_v21 }
 0x187   : > { %v1608_v50 = vpop.eup %1607  ;;  %v531_v7 = vmul.f32 1.442695, %v489_v39  ;;  %v533_v46 = vmul.f32 1.442695, %v490_v42  ;;  %v575_v12 = vpack.c.bf16 %v1606_v45, %v1602_v19 }
 0x188   : > { %v451_v48 = vpop.xlane.xlu0 %450  ;;  %v576_v17 = vpack.c.bf16 %v1608_v50, %v1604_v36  ;;  %v2120_v26 = vadd.f32 %v1608_v50, %v1606_v45  ;;  %v2421_v36 = vld [vmem:[#allocation9_spill] sm:$0xff] }
 0x189   : > { %1621 = vpow2.f32 %v531_v7  ;;  %v491_v57 = vsub.f32 %v2010_v58, %v451_v48  ;;  %v492_v0 = vsub.f32 %v2014_v60, %v451_v48  ;;  %v2422_v7 = vld [vmem:[#allocation10_spill] sm:$0xff] }
 0x18a   : > { %v1610_v44 = vpop.eup %1609  ;;  %1623 = vpow2.f32 %v533_v46  ;;  %880 = vmatprep.mubr.bf16.mxu0 %v576_v17 }
 0x18b   : > { %v1612_v51 = vpop.eup %1611  ;;  %v535_v54 = vmul.f32 1.442695, %v491_v57  ;;  %881 = vmatmul.mubr.bf16.vlgmr.msra.gmra.mxu0 %v575_v12  ;;  %v537_v5 = vmul.f32 1.442695, %v492_v0  ;;  %v2423_v12 = vld [vmem:[#allocation11_spill] sm:$0xff] }
 0x18c   : > { %v454_v41 = vpop.xlane.xlu1 %453  ;;  %v2124_v29 = vadd.f32 %v1612_v51, %v1610_v44 }
 0x18d   : > { %v493_v32 = vsub.f32 %v2020_v63, %v454_v41  ;;  %v494_v56 = vsub.f32 %v2026_v3, %v454_v41  ;;  %1625 = vpow2.f32 %v535_v54  ;;  %v2424_v54 = vld [vmem:[#allocation12_spill] sm:$0xff]  ;;  %v2425_v41 = vld [vmem:[#allocation13_spill] sm:$0xff] }
 0x18e   : > { %v1614_v53 = vpop.eup %1613  ;;  %1627 = vpow2.f32 %v537_v5 }
 0x18f   : > { %v1616_v61 = vpop.eup %1615  ;;  %v539_v58 = vmul.f32 1.442695, %v493_v32  ;;  %v541_v59 = vmul.f32 1.442695, %v494_v56  ;;  %v577_v60 = vpack.c.bf16 %v1614_v53, %v1610_v44 }
 0x190   : > { %v457_v49 = vpop.xlane.xlu0 %456  ;;  %v578_v55 = vpack.c.bf16 %v1616_v61, %v1612_v51  ;;  %v2128_v47 = vadd.f32 %v1616_v61, %v1614_v53 }
 0x191   : > { %1629 = vpow2.f32 %v539_v58  ;;  %v495_v52 = vsub.f32 %v2032_v8, %v457_v49  ;;  %v496_v1 = vsub.f32 %v2036_v10, %v457_v49 }
 0x192   : > { %v1618_v37 = vpop.eup %1617  ;;  %1631 = vpow2.f32 %v541_v59  ;;  %888 = vmatprep.mubr.bf16.mxu0 %v578_v55  ;;  %v2426_v55 = vld [vmem:[#allocation14_spill] sm:$0xff] }
 0x193   : > { %v1620_v63 = vpop.eup %1619  ;;  %v543_v3 = vmul.f32 1.442695, %v495_v52  ;;  %889 = vmatmul.mubr.bf16.gmra.mxu0 %v577_v60  ;;  %v545_v43 = vmul.f32 1.442695, %v496_v1  ;;  %v2427_v1 = vld [vmem:[#allocation15_spill] sm:$0xff] }
 0x194   : > { %v460_v35 = vpop.xlane.xlu1 %459  ;;  %v2132_v40 = vadd.f32 %v1620_v63, %v1618_v37 }
 0x195   : > { %v497_v25 = vsub.f32 %v2040_v13, %v460_v35  ;;  %v498_v31 = vsub.f32 %v2042_v15, %v460_v35  ;;  %1633 = vpow2.f32 %v543_v3 }
 0x196   : > { %v1622_v2 = vpop.eup %1621  ;;  %1635 = vpow2.f32 %v545_v43 }
 0x197   : > { %v1624_v23 = vpop.eup %1623  ;;  %v547_v8 = vmul.f32 1.442695, %v497_v25  ;;  %v549_v28 = vmul.f32 1.442695, %v498_v31  ;;  %v579_v10 = vpack.c.bf16 %v1622_v2, %v1618_v37 }
 0x198   : > { %v463_v22 = vpop.xlane.xlu0 %462  ;;  %v580_v24 = vpack.c.bf16 %v1624_v23, %v1620_v63  ;;  %v2136_v6 = vadd.f32 %v1624_v23, %v1622_v2 }
 0x199   : > { %1637 = vpow2.f32 %v547_v8  ;;  %v499_v9 = vsub.f32 %v2046_v18, %v463_v22  ;;  %v500_v30 = vsub.f32 %v2419_v27, %v463_v22 }
 0x19a   : > { %1639 = vpow2.f32 %v549_v28  ;;  %896 = vmatprep.mubr.bf16.mxu0 %v580_v24  ;;  %v2140_v15 = vpop.eup %1625 }
 0x19b   : > { %v551_v13 = vmul.f32 1.442695, %v499_v9  ;;  %897 = vmatmul.mubr.bf16.gmra.mxu0 %v579_v10  ;;  %v553_v11 = vmul.f32 1.442695, %v500_v30  ;;  %v2142_v16 = vpop.eup %1627 }
 0x19c   : > { %v466_v14 = vpop.xlane.xlu1 %465 }
 0x19d   : > { %v501_v19 = vsub.f32 %v2420_v34, %v466_v14  ;;  %v502_v20 = vsub.f32 %v2421_v36, %v466_v14  ;;  %1641 = vpow2.f32 %v551_v13 }
 0x19e   : > { %v2146_v21 = vpop.eup %1629  ;;  %1643 = vpow2.f32 %v553_v11 }
 0x19f   : > { %v2148_v33 = vpop.eup %1631  ;;  %v555_v18 = vmul.f32 1.442695, %v501_v19  ;;  %v557_v39 = vmul.f32 1.442695, %v502_v20  ;;  %v581_v42 = vpack.c.bf16 %v2146_v21, %v2140_v15 }
 0x1a0   : > { %v469_v45 = vpop.xlane.xlu0 %468  ;;  %v582_v50 = vpack.c.bf16 %v2148_v33, %v2142_v16 }
 0x1a1   : > { %1645 = vpow2.f32 %v555_v18  ;;  %v503_v46 = vsub.f32 %v2422_v7, %v469_v45  ;;  %v504_v48 = vsub.f32 %v2423_v12, %v469_v45 }
 0x1a2   : > { %1647 = vpow2.f32 %v557_v39  ;;  %904 = vmatprep.mubr.bf16.mxu0 %v582_v50  ;;  %v2156_v57 = vpop.eup %1633  ;;  %v2428_v50 = vmov 0  }
 0x1a3   : > { %v559_v17 = vmul.f32 1.442695, %v503_v46  ;;  %905 = vmatmul.mubr.bf16.gmra.mxu0 %v581_v42  ;;  %v561_v0 = vmul.f32 1.442695, %v504_v48  ;;  %v2158_v51 = vpop.eup %1635  ;;  %v609_v48 = vadd.f32 %v2142_v16, %v2140_v15  ;;  %v1760_v15 = vmov 0.0  }
 0x1a4   : > { %v472_v44 = vpop.xlane.xlu1 %471  ;;  %v615_v46 = vadd.f32 %v2158_v51, %v2156_v57  ;;  %1498 = vmatprep.subr.mxu1 %v1760_v15  ;;  %1530 = vmatprep.mubr.msk.f32.mxu1 %vm1761_vm2, %v1760_v15 }
 0x1a5   : > { %v505_v5 = vsub.f32 %v2424_v54, %v472_v44  ;;  %v506_v32 = vsub.f32 %v2425_v41, %v472_v44  ;;  %1649 = vpow2.f32 %v559_v17 }
 0x1a6   : > { %v2162_v56 = vpop.eup %1637  ;;  %1651 = vpow2.f32 %v561_v0  ;;  %v612_v0 = vadd.f32 %v2148_v33, %v2146_v21 }
 0x1a7   : > { %v2164_v53 = vpop.eup %1639  ;;  %v563_v61 = vmul.f32 1.442695, %v505_v5  ;;  %v565_v58 = vmul.f32 1.442695, %v506_v32  ;;  %v583_v59 = vpack.c.bf16 %v2162_v56, %v2156_v57 }
 0x1a8   : > { %v475_v60 = vpop.xlane.xlu0 %474  ;;  %v584_v49 = vpack.c.bf16 %v2164_v53, %v2158_v51  ;;  %v618_v17 = vadd.f32 %v2164_v53, %v2162_v56 }
 0x1a9   : > { %1653 = vpow2.f32 %v563_v61  ;;  %v507_v52 = vsub.f32 %v2426_v55, %v475_v60  ;;  %v508_v37 = vsub.f32 %v2427_v1, %v475_v60 }
 0x1aa   : > { %1655 = vpow2.f32 %v565_v58  ;;  %912 = vmatprep.mubr.bf16.mxu0 %v584_v49  ;;  %v1642_v43 = vpop.eup %1641 }
 0x1ab   : > { %v567_v63 = vmul.f32 1.442695, %v507_v52  ;;  %v569_v3 = vmul.f32 1.442695, %v508_v37  ;;  %913 = vmatmul.mubr.bf16.gmra.mxu0 %v583_v59  ;;  %v1644_v25 = vpop.eup %1643 }
 0x1ac   : > { %v478_v35 = vpop.xlane.xlu1 %477  ;;  %v621_v45 = vadd.f32 %v1644_v25, %v1642_v43 }
 0x1ad   : > { %1657 = vpow2.f32 %v567_v63  ;;  %v509_v31 = vsub.f32 %v2076_v4, %v478_v35  ;;  %v510_v2 = vsub.f32 %v2078_v62, %v478_v35 }
 0x1ae   : > { %v1646_v23 = vpop.eup %1645  ;;  %1659 = vpow2.f32 %v569_v3 }
 0x1af   : > { %v1648_v8 = vpop.eup %1647  ;;  %v571_v28 = vmul.f32 1.442695, %v509_v31  ;;  %v573_v10 = vmul.f32 1.442695, %v510_v2  ;;  %v585_v22 = vpack.c.bf16 %v1646_v23, %v1642_v43 }
 0x1b0   : > { %v586_v24 = vpack.c.bf16 %v1648_v8, %v1644_v25  ;;  %v624_v12 = vadd.f32 %v1648_v8, %v1646_v23 }
 0x1b1   : > { %1661 = vpow2.f32 %v571_v28 }
 0x1b2   : > { %1663 = vpow2.f32 %v573_v10  ;;  %920 = vmatprep.mubr.bf16.mxu0 %v586_v24  ;;  %v1650_v9 = vpop.eup %1649  ;;  %v992_v10 = vld [vmem:[%s2384_s4 + $0x78] sm:$0xff] }
 0x1b3   : > { %921 = vmatmul.mubr.bf16.gmra.mxu0 %v585_v22  ;;  %v1652_v27 = vpop.eup %1651 }
 0x1b4   : > { %v627_v18 = vadd.f32 %v1652_v27, %v1650_v9 }
 0x1b6   : > { %v1654_v30 = vpop.eup %1653 }
 0x1b7   : > { %v1656_v13 = vpop.eup %1655  ;;  %v587_v11 = vpack.c.bf16 %v1654_v30, %v1650_v9 }
 0x1b8   : > { %v588_v14 = vpack.c.bf16 %v1656_v13, %v1652_v27  ;;  %v630_v7 = vadd.f32 %v1656_v13, %v1654_v30 }
 0x1ba   : > { %v1658_v4 = vpop.eup %1657  ;;  %928 = vmatprep.mubr.bf16.mxu0 %v588_v14 }
 0x1bb   : > { %v1660_v62 = vpop.eup %1659  ;;  %929 = vmatmul.mubr.bf16.gmra.mxu0 %v587_v11  ;;  %v991_v11 = vld [vmem:[%s2384_s4 + $0x70] sm:$0xff] }
 0x1bc   : > { %v633_v34 = vadd.f32 %v1660_v62, %v1658_v4 }
 0x1be   : > { %v1662_v19 = vpop.eup %1661  ;;  %634 = vadd.xlane.f32.xlu1 %v633_v34 }
 0x1bf   : > { %v1664_v36 = vpop.eup %1663  ;;  %v589_v20 = vpack.c.bf16 %v1662_v19, %v1658_v4 }
 0x1c0   : > { %v590_v39 = vpack.c.bf16 %v1664_v36, %v1660_v62  ;;  %v636_v42 = vadd.f32 %v1664_v36, %v1662_v19  ;;  %v990_v19 = vld [vmem:[%s2384_s4 + $0x68] sm:$0xff] }
 0x1c2   : > { %628 = vadd.xlane.f32.xlu1 %v627_v18  ;;  %936 = vmatprep.mubr.bf16.mxu0 %v590_v39 }
 0x1c3   : > { %637 = vadd.xlane.f32.xlu0 %v636_v42  ;;  %937 = vmatmul.mubr.bf16.gmra.mxu0 %v589_v20 }
 0x1c4   : > { %1328 = vmatprep.mubr.bf16.mxu0 %v2428_v50 }
 0x1c6   : > { %622 = vadd.xlane.f32.xlu1 %v621_v45  ;;  %v989_v45 = vld [vmem:[%s2384_s4 + $0x60] sm:$0xff] }
 0x1c7   : > { %631 = vadd.xlane.f32.xlu0 %v630_v7 }
 0x1ca   : > { %616 = vadd.xlane.f32.xlu1 %v615_v46 }
 0x1cb   : > { %625 = vadd.xlane.f32.xlu0 %v624_v12 }
 0x1ce   : > { %610 = vadd.xlane.f32.xlu1 %v609_v48 }
 0x1cf   : > { %619 = vadd.xlane.f32.xlu0 %v618_v17  ;;  %v988_v17 = vld [vmem:[%s2384_s4 + $0x58] sm:$0xff] }
 0x1d2   : > { %604 = vadd.xlane.f32.xlu1 %v2132_v40 }
 0x1d3   : > { %613 = vadd.xlane.f32.xlu0 %v612_v0 }
 0x1d6   : > { %598 = vadd.xlane.f32.xlu1 %v2124_v29 }
 0x1d7   : > { %607 = vadd.xlane.f32.xlu0 %v2136_v6 }
 0x1da   : > { %592 = vadd.xlane.f32.xlu1 %v2116_v38 }
 0x1db   : > { %601 = vadd.xlane.f32.xlu0 %v2128_v47 }
 0x1df   : > { %595 = vadd.xlane.f32.xlu0 %v2120_v26 }
 0x247   : > { %v635_v52 = vpop.xlane.xlu1 %634 }
 0x24b   : > { %v2191_v16 = vpop.f32.mrf.mxu0  ;;  %v629_v35 = vpop.xlane.xlu1 %628 }
 0x24c   : > { %v638_v49 = vpop.xlane.xlu0 %637 }
 0x24d   : > { %v884_v40 = vpop.f32.mrf.mxu0  ;;  %1665 = vrcp.f32 %v638_v49 }
 0x24e   : > { %1667 = vrcp.f32 %v635_v52 }
 0x24f   : > { %v2193_v21 = vpop.f32.mrf.mxu0  ;;  %v623_v9 = vpop.xlane.xlu1 %622 }
 0x250   : > { %v632_v63 = vpop.xlane.xlu0 %631 }
 0x251   : > { %v887_v29 = vpop.f32.mrf.mxu0  ;;  %1669 = vrcp.f32 %v632_v63 }
 0x252   : > { %1671 = vrcp.f32 %v629_v35 }
 0x253   : > { %v2195_v33 = vpop.f32.mrf.mxu0  ;;  %v617_v20 = vpop.xlane.xlu1 %616 }
 0x254   : > { %v626_v2 = vpop.xlane.xlu0 %625 }
 0x255   : > { %v892_v6 = vpop.f32.mrf.mxu0  ;;  %1673 = vrcp.f32 %v626_v2 }
 0x256   : > { %1675 = vrcp.f32 %v623_v9 }
 0x257   : > { %v2197_v38 = vpop.f32.mrf.mxu0  ;;  %v611_v48 = vpop.xlane.xlu1 %610 }
 0x258   : > { %v620_v4 = vpop.xlane.xlu0 %619 }
 0x259   : > { %v895_v47 = vpop.f32.mrf.mxu0  ;;  %1677 = vrcp.f32 %v620_v4 }
 0x25a   : > { %v1666_v8 = vpop.eup %1665  ;;  %1679 = vrcp.f32 %v617_v20  ;;  %v987_v47 = vld [vmem:[%s2384_s4 + $0x50] sm:$0xff] }
 0x25b   : > { %v2199_v57 = vpop.f32.mrf.mxu0  ;;  %v1668_v24 = vpop.eup %1667 }
 0x25c   : > { %v614_v42 = vpop.xlane.xlu0 %613 }
 0x25d   : > { %v900_v26 = vpop.f32.mrf.mxu0  ;;  %1681 = vrcp.f32 %v614_v42  ;;  %v1595_v42 = vld [vmem:[%s2381_s1 + $0x10] sm:$0xff]  }
 0x25e   : > { %v1670_v14 = vpop.eup %1669  ;;  %1683 = vrcp.f32 %v611_v48  ;;  %v1600_v48 = vld [vmem:[%s2381_s1 + $0x38] sm:$0xff]  }
 0x25f   : > { %v2201_v44 = vpop.f32.mrf.mxu0  ;;  %v1672_v36 = vpop.eup %1671 }
 0x260   : > { %v608_v6 = vpop.xlane.xlu0 %607 }
 0x261   : > { %v903_v51 = vpop.f32.mrf.mxu0  ;;  %1685 = vrcp.f32 %v608_v6 }
 0x262   : > { %v1674_v7 = vpop.eup %1673 }
 0x263   : > { %v2203_v54 = vpop.f32.mrf.mxu0  ;;  %v1676_v0 = vpop.eup %1675 }
 0x265   : > { %v908_v5 = vpop.f32.mrf.mxu0 }
 0x266   : > { %v1678_v26 = vpop.eup %1677 }
 0x267   : > { %v2205_v41 = vpop.f32.mrf.mxu0 }
 0x269   : > { %v911_v32 = vpop.f32.mrf.mxu0 }
 0x26a   : > { %v605_v32 = vpop.xlane.xlu1 %604 }
 0x26b   : > { %v2207_v56 = vpop.f32.mrf.mxu0  ;;  %1687 = vrcp.f32 %v605_v32 }
 0x26d   : > { %v916_v53 = vpop.f32.mrf.mxu0 }
 0x26e   : > { %v986_v53 = vld [vmem:[%s2384_s4 + $0x48] sm:$0xff]  ;;  %v599_v63 = vpop.xlane.xlu1 %598 }
 0x26f   : > { %v2209_v61 = vpop.f32.mrf.mxu0 }
 0x270   : > { %v970_v51 = vmul.f32 %v1678_v26, %v2209_v61  ;;  %v985_v61 = vld [vmem:[%s2384_s4 + $0x40] sm:$0xff] }
 0x271   : > { %v919_v58 = vpop.f32.mrf.mxu0 }
 0x272   : > { %v1680_v58 = vpop.eup %1679 }
 0x273   : > { %v922_v59 = vpop.f32.mrf.mxu0  ;;  %v1682_v49 = vpop.eup %1681 }
 0x274   : > { %v971_v40 = vmul.f32 %v1676_v0, %v922_v59  ;;  %v969_v59 = vmul.f32 %v1680_v58, %v2207_v56  ;;  %v968_v52 = vmul.f32 %v1682_v49, %v2205_v41  ;;  %v984_v56 = vld [vmem:[%s2384_s4 + $0x38] sm:$0xff] }
 0x275   : > { %v924_v60 = vpop.f32.mrf.mxu0 }
 0x276   : > { %v1003_v5 = vmul.f32 %v987_v47, %v971_v40  ;;  %v1002_v60 = vmul.f32 %v986_v53, %v970_v51 }
 0x277   : > { %v925_v55 = vpop.f32.mrf.mxu0 }
 0x278   : > { %v972_v46 = vmul.f32 %v1674_v7, %v925_v55  ;;  %v602_v55 = vpop.xlane.xlu0 %601  ;;  %v1597_v7 = vld [vmem:[%s2381_s1 + $0x20] sm:$0xff]  }
 0x279   : > { %v927_v1 = vpop.f32.mrf.mxu0  ;;  %1689 = vrcp.f32 %v602_v55 }
 0x27a   : > { %v1004_v29 = vmul.f32 %v988_v17, %v972_v46  ;;  %v1001_v1 = vmul.f32 %v985_v61, %v969_v59  ;;  %1691 = vrcp.f32 %v599_v63  ;;  %v1598_v46 = vld [vmem:[%s2381_s1 + $0x28] sm:$0xff]   ;;  %v1290_v17 = vld [vmem:[%s2383_s3] sm:$0xf] }
 0x27b   : > { %v930_v37 = vpop.f32.mrf.mxu0  ;;  %1293 = vperm.xlu0 %1575, %v1290_v17  }
 0x27c   : > { %v973_v18 = vmul.f32 %v1672_v36, %v930_v37  ;;  %v1684_v37 = vpop.eup %1683  ;;  %v596_v41 = vpop.xlane.xlu0 %595  ;;  %v977_v36 = vld [vmem:[%s2384_s4] sm:$0xff] }
 0x27d   : > { %v932_v3 = vpop.f32.mrf.mxu0  ;;  %v1686_v35 = vpop.eup %1685  ;;  %1693 = vrcp.f32 %v596_v41 }
 0x27e   : > { %v1005_v12 = vmul.f32 %v989_v45, %v973_v18  ;;  %v967_v3 = vmul.f32 %v1684_v37, %v2203_v54  ;;  %v966_v2 = vmul.f32 %v1686_v35, %v2201_v44  ;;  %v982_v54 = vld [vmem:[%s2384_s4 + $0x28] sm:$0xff]  ;;  %v2429_v18 = vld [vmem:[#allocation5_spill] sm:$0xff]  ;;  %v1596_v45 = vld [vmem:[%s2381_s1 + $0x18] sm:$0xff]  }
 0x27f   : > { %v933_v43 = vpop.f32.mrf.mxu0 }
 0x280   : > { %v974_v62 = vmul.f32 %v1670_v14, %v933_v43  ;;  %v1000_v43 = vmul.f32 %v984_v56, %v968_v52  ;;  %v979_v14 = vld [vmem:[%s2384_s4 + $0x10] sm:$0xff] }
 0x281   : > { %v935_v25 = vpop.f32.mrf.mxu0 }
 0x282   : > { %v1006_v39 = vmul.f32 %v990_v19, %v974_v62  ;;  %v983_v25 = vld [vmem:[%s2384_s4 + $0x30] sm:$0xff] }
 0x283   : > { %v938_v31 = vpop.f32.mrf.mxu0 }
 0x284   : > { %v975_v30 = vmul.f32 %v1668_v24, %v938_v31  ;;  %v999_v31 = vmul.f32 %v983_v25, %v967_v3  ;;  %v981_v24 = vld [vmem:[%s2384_s4 + $0x20] sm:$0xff] }
 0x285   : > { %v940_v23 = vpop.f32.mrf.mxu0 }
 0x286   : > { %v1007_v34 = vmul.f32 %v991_v11, %v975_v30  ;;  %v1688_v23 = vpop.eup %1687  ;;  %v980_v30 = vld [vmem:[%s2384_s4 + $0x18] sm:$0xff] }
 0x287   : > { %v941_v28 = vpop.f32.mrf.mxu0 }
 0x288   : > { %v976_v22 = vmul.f32 %v1666_v8, %v941_v28  ;;  %v593_v8 = vpop.xlane.xlu1 %592  ;;  %v998_v28 = vmul.f32 %v982_v54, %v966_v2 }
 0x289   : > { %v943_v27 = vpop.f32.mrf.mxu0  ;;  %1695 = vrcp.f32 %v593_v8 }
 0x28a   : > { %v1008_v13 = vmul.f32 %v992_v10, %v976_v22  ;;  %v965_v10 = vmul.f32 %v1688_v23, %v2199_v57  ;;  %v1690_v22 = vpop.eup %1689 }
 0x28b   : > { %v964_v9 = vmul.f32 %v1690_v22, %v2197_v38  ;;  %v1692_v27 = vpop.eup %1691 }
 0x28c   : > { %1499 = vmatpush3.xpose.msra.mxu1 %v1008_v13  ;;  %v997_v44 = vmul.f32 %v981_v24, %v965_v10  ;;  %v963_v13 = vmul.f32 %v1692_v27, %v2195_v33  ;;  %v1694_v11 = vpop.eup %1693 }
 0x28d   : > { %1500 = vmatprep.subr.mxu1 %v1760_v15  ;;  %v996_v57 = vmul.f32 %v980_v30, %v964_v9  ;;  %v962_v4 = vmul.f32 %v1694_v11, %v2193_v21  ;;  %v1009_v21 = vld [vmem:[%s2382_s2] sm:$0xf] }
 0x28e   : > { %v995_v38 = vmul.f32 %v979_v14, %v963_v13 }
 0x290   : > { %1501 = vmatpush3.xpose.msra.mxu1 %v1007_v34  ;;  %v978_v34 = vld [vmem:[%s2384_s4 + $0x8] sm:$0xff] }
 0x291   : > { %1502 = vmatprep.subr.mxu1 %v1760_v15  ;;  %v994_v33 = vmul.f32 %v978_v34, %v962_v4 }
 0x294   : > { %1503 = vmatpush3.xpose.msra.mxu1 %v1006_v39  ;;  %v2430_v39 = vld [vmem:[#allocation6_spill] sm:$0xff] }
 0x295   : > { %1504 = vmatprep.subr.mxu1 %v1760_v15 }
 0x296   : > { %v1696_v62 = vpop.eup %1695 }
 0x297   : > { %v961_v19 = vmul.f32 %v1696_v62, %v2191_v16  ;;  %v1593_v16 = vld [vmem:[%s2381_s1] sm:$0xff]  }
 0x298   : > { %1505 = vmatpush3.xpose.msra.mxu1 %v1005_v12  ;;  %v1599_v12 = vld [vmem:[%s2381_s1 + $0x30] sm:$0xff]  }
 0x299   : > { %1506 = vmatprep.subr.mxu1 %v1760_v15  ;;  %v993_v20 = vmul.f32 %v977_v36, %v961_v19 }
 0x29c   : > { %1507 = vmatpush3.xpose.msra.mxu1 %v1004_v29 }
 0x29d   : > { %1508 = vmatprep.subr.mxu1 %v1760_v15 }
 0x2a0   : > { %1509 = vmatpush3.xpose.msra.mxu1 %v1003_v5 }
 0x2a1   : > { %1510 = vmatprep.subr.mxu1 %v1760_v15 }
 0x2a4   : > { %1511 = vmatpush3.xpose.msra.mxu1 %v1002_v60 }
 0x2a5   : > { %1512 = vmatprep.subr.mxu1 %v1760_v15 }
 0x2a8   : > { %1513 = vmatpush3.xpose.msra.mxu1 %v1001_v1 }
 0x2a9   : > { %1514 = vmatprep.subr.mxu1 %v1760_v15 }
 0x2ac   : > { %1515 = vmatpush3.xpose.msra.mxu1 %v1000_v43 }
 0x2ad   : > { %1516 = vmatprep.subr.mxu1 %v1760_v15 }
 0x2b0   : > { %1517 = vmatpush3.xpose.msra.mxu1 %v999_v31 }
 0x2b1   : > { %1518 = vmatprep.subr.mxu1 %v1760_v15 }
 0x2b4   : > { %1519 = vmatpush3.xpose.msra.mxu1 %v998_v28 }
 0x2b5   : > { %1520 = vmatprep.subr.mxu1 %v1760_v15 }
 0x2b8   : > { %1521 = vmatpush3.xpose.msra.mxu1 %v997_v44 }
 0x2b9   : > { %1522 = vmatprep.subr.mxu1 %v1760_v15 }
 0x2bc   : > { %1523 = vmatpush3.xpose.msra.mxu1 %v996_v57 }
 0x2bd   : > { %1524 = vmatprep.subr.mxu1 %v1760_v15 }
 0x2c0   : > { %1525 = vmatpush3.xpose.msra.mxu1 %v995_v38 }
 0x2c1   : > { %1526 = vmatprep.subr.mxu1 %v1760_v15 }
 0x2c4   : > { %1527 = vmatpush3.xpose.msra.mxu1 %v994_v33 }
 0x2c5   : > { %1528 = vmatprep.subr.mxu1 %v1760_v15  ;;  %v1594_v15 = vld [vmem:[%s2381_s1 + $0x8] sm:$0xff]  }
 0x2c8   : > { %1529 = vmatpush3.xpose.msra.mxu1 %v993_v20 }
 0x2c9   : > { %1465 = vmatprep.subr.msk.bf16.mxu1 %vm311_vm0, %v2429_v18 }
 0x2cb   : > { %1531 = vmatmul.mubr.f32.vlgmr.msra.gmra.mxu1 %v1009_v21 }
 0x2cc   : > { %1175 = vmatpush1.bf16.msra.mxu1 %v2430_v39  ;;  %1192 = vmatprep.mubr.bf16.mxu1 %v2428_v50 }
 0x2cf   : > { %1466 = vmatmul.mubr.msk.bf16.vlgmr.msra.gmra.mxu1 %vm286_vm1, %v1593_v16 }
 0x2d0   : > { %1202 = vmatprep.mubr.bf16.mxu1 %v2428_v50 }
 0x2d7   : > { %1467 = vmatmul.mubr.msk.bf16.gmra.mxu1 %vm286_vm1, %v1594_v15 }
 0x2d8   : > { %1212 = vmatprep.mubr.bf16.mxu1 %v2428_v50 }
 0x2df   : > { %1468 = vmatmul.mubr.msk.bf16.gmra.mxu1 %vm286_vm1, %v1595_v42 }
 0x2e0   : > { %1222 = vmatprep.mubr.bf16.mxu1 %v2428_v50 }
 0x2e7   : > { %1469 = vmatmul.mubr.msk.bf16.gmra.mxu1 %vm286_vm1, %v1596_v45 }
 0x2e8   : > { %1232 = vmatprep.mubr.bf16.mxu1 %v2428_v50 }
 0x2ef   : > { %1470 = vmatmul.mubr.msk.bf16.gmra.mxu1 %vm286_vm1, %v1597_v7 }
 0x2f0   : > { %1242 = vmatprep.mubr.bf16.mxu1 %v2428_v50 }
 0x2f6   : > { %v1294_v20 = vpop.permute.xlu0 %1293 }
 0x2f7   : > { %1471 = vmatmul.mubr.msk.bf16.gmra.mxu1 %vm286_vm1, %v1598_v46 }
 0x2f8   : > { %1252 = vmatprep.mubr.bf16.mxu1 %v2428_v50 }
 0x2ff   : > { %1472 = vmatmul.mubr.msk.bf16.gmra.mxu1 %vm286_vm1, %v1599_v12 }
 0x300   : > { %1262 = vmatprep.mubr.bf16.mxu1 %v2428_v50 }
 0x307   : > { %1473 = vmatmul.mubr.msk.bf16.gmra.mxu1 %vm286_vm1, %v1600_v48 }
 0x38b   : > { %v2333_v0 = vpop.f32.mrf.mxu1 }
 0x38c   : > { %v1273_v36 = vpack.c.bf16 %v2333_v0, %v2333_v0 }
 0x38d   : > { %v1532_v40 = vpop.f32.mrf.mxu1 }
 0x38f   : > { %v2335_v29 = vpop.f32.mrf.mxu1 }
 0x391   : > { %v1196_v6 = vpop.f32.mrf.mxu1 }
 0x393   : > { %v1198_v47 = vpop.f32.mrf.mxu1 }
 0x394   : > { %v1274_v50 = vpack.c.bf16 %v1198_v47, %v2335_v29 }
 0x395   : > { %v1200_v26 = vpop.f32.mrf.mxu1 }
 0x396   : > { %v1275_v51 = vpack.c.bf16 %v1200_v26, %v1196_v6 }
 0x397   : > { %v1204_v5 = vpop.f32.mrf.mxu1 }
 0x399   : > { %v1206_v32 = vpop.f32.mrf.mxu1 }
 0x39b   : > { %v1208_v53 = vpop.f32.mrf.mxu1 }
 0x39c   : > { %v1276_v58 = vpack.c.bf16 %v1208_v53, %v1204_v5 }
 0x39d   : > { %v1210_v59 = vpop.f32.mrf.mxu1 }
 0x39e   : > { %v1277_v60 = vpack.c.bf16 %v1210_v59, %v1206_v32 }
 0x39f   : > { %v1214_v49 = vpop.f32.mrf.mxu1 }
 0x3a1   : > { %v1216_v55 = vpop.f32.mrf.mxu1 }
 0x3a3   : > { %v1218_v61 = vpop.f32.mrf.mxu1 }
 0x3a4   : > { %v1278_v19 = vpack.c.bf16 %v1218_v61, %v1214_v49 }
 0x3a5   : > { %v1220_v52 = vpop.f32.mrf.mxu1 }
 0x3a6   : > { %v1279_v33 = vpack.c.bf16 %v1220_v52, %v1216_v55 }
 0x3a7   : > { %v1224_v1 = vpop.f32.mrf.mxu1 }
 0x3a9   : > { %v1226_v37 = vpop.f32.mrf.mxu1 }
 0x3ab   : > { %v1228_v63 = vpop.f32.mrf.mxu1 }
 0x3ac   : > { %v1280_v34 = vpack.c.bf16 %v1228_v63, %v1224_v1 }
 0x3ad   : > { %v1230_v56 = vpop.f32.mrf.mxu1 }
 0x3ae   : > { %v1281_v62 = vpack.c.bf16 %v1230_v56, %v1226_v37 }
 0x3af   : > { %v1234_v3 = vpop.f32.mrf.mxu1 }
 0x3b1   : > { %v1236_v43 = vpop.f32.mrf.mxu1 }
 0x3b3   : > { %v1238_v35 = vpop.f32.mrf.mxu1 }
 0x3b4   : > { %v1282_v4 = vpack.c.bf16 %v1238_v35, %v1234_v3 }
 0x3b5   : > { %v1240_v25 = vpop.f32.mrf.mxu1 }
 0x3b6   : > { %v1283_v38 = vpack.c.bf16 %v1240_v25, %v1236_v43 }
 0x3b7   : > { %v1244_v41 = vpop.f32.mrf.mxu1 }
 0x3b9   : > { %v1246_v31 = vpop.f32.mrf.mxu1 }
 0x3bb   : > { %v1248_v2 = vpop.f32.mrf.mxu1 }
 0x3bc   : > { %v1284_v14 = vpack.c.bf16 %v1248_v2, %v1244_v41 }
 0x3bd   : > { %v1250_v23 = vpop.f32.mrf.mxu1 }
 0x3be   : > { %v1285_v11 = vpack.c.bf16 %v1250_v23, %v1246_v31 }
 0x3bf   : > { %v1254_v8 = vpop.f32.mrf.mxu1 }
 0x3c1   : > { %v1256_v54 = vpop.f32.mrf.mxu1 }
 0x3c3   : > { %v1258_v28 = vpop.f32.mrf.mxu1 }
 0x3c4   : > { %v1286_v13 = vpack.c.bf16 %v1258_v28, %v1254_v8 }
 0x3c5   : > { %v1260_v10 = vpop.f32.mrf.mxu1 }
 0x3c6   : > { %v1287_v57 = vpack.c.bf16 %v1260_v10, %v1256_v54 }
 0x3c7   : > { %v1264_v22 = vpop.f32.mrf.mxu1 }
 0x3c9   : > { %v1266_v24 = vpop.f32.mrf.mxu1 }
 0x3cb   : > { %v1268_v44 = vpop.f32.mrf.mxu1 }
 0x3cc   : > { %v1288_v30 = vpack.c.bf16 %v1268_v44, %v1264_v22 }
 0x3cd   : > { %v1270_v9 = vpop.f32.mrf.mxu1 }
 0x3ce   : > { %v1289_v27 = vpack.c.bf16 %v1270_v9, %v1266_v24 }
 0x3d0   : > { %1296 = vmatprep.subr.bf16.mxu0 %v1289_v27 }
 0x3d1   : > { %1297 = vmatpush1.bf16.msra.mxu0 %v1288_v30 }
 0x3d2   : > { %1298 = vmatprep.subr.bf16.mxu0 %v1287_v57 }
 0x3d5   : > { %1299 = vmatpush1.bf16.msra.mxu0 %v1286_v13 }
 0x3d6   : > { %1300 = vmatprep.subr.bf16.mxu0 %v1285_v11 }
 0x3d9   : > { %1301 = vmatpush1.bf16.msra.mxu0 %v1284_v14 }
 0x3da   : > { %1302 = vmatprep.subr.bf16.mxu0 %v1283_v38 }
 0x3dd   : > { %1303 = vmatpush1.bf16.msra.mxu0 %v1282_v4 }
 0x3de   : > { %1304 = vmatprep.subr.bf16.mxu0 %v1281_v62 }
 0x3e1   : > { %1305 = vmatpush1.bf16.msra.mxu0 %v1280_v34 }
 0x3e2   : > { %1306 = vmatprep.subr.bf16.mxu0 %v1279_v33 }
 0x3e5   : > { %1307 = vmatpush1.bf16.msra.mxu0 %v1278_v19 }
 0x3e6   : > { %1308 = vmatprep.subr.bf16.mxu0 %v1277_v60 }
 0x3e9   : > { %1309 = vmatpush1.bf16.msra.mxu0 %v1276_v58 }
 0x3ea   : > { %1310 = vmatprep.subr.bf16.mxu0 %v1275_v51 }
 0x3ed   : > { %1311 = vmatpush1.bf16.msra.mxu0 %v1274_v50 }
 0x3f0   : > { %1329 = vmatmul.mubr.bf16.vlgmr.msra.gmra.mxu0 %v1273_v36 }
 0x4b0   : > { %v1330_v21 = vpop.f32.mrf.mxu0 }
 0x4b1   : > { %v1331_v16 = vadd.f32 %v1330_v21, %v1294_v20 }
 0x4b2   : > { %v1332_v18 = vpop.f32.mrf.mxu0 }
 0x4b3   : > { %v1333_v39 = vadd.f32 %v1332_v18, %v1294_v20 }
 0x4b4   : > { %v1334_v15 = vpop.f32.mrf.mxu0 }
 0x4b5   : > { %v1339_v42 = vcombine.low %v1331_v16, %v1333_v39 }
 0x4b6   : > { %v1335_v45 = vpop.f32.mrf.mxu0 }
 0x4b7   : > { %1341 = vst [vmem:[%s217_s17] sm:$0xff] %v1339_v42 }
 0x4b8   : > { %1710 = shalt.err (!%p1707_p3)
}
 0x4b9   : > { %s1711_s10 = scalar_lea.hbm %s2345_s30, 128  ;;  %s1715_s13 = scalar_lea.hbm %s2385_s5, 256 }
 0x4ba   : > { %p1712_p4 = scmp.ne.s32.totalorder %s2345_s30, %s1711_s10  ;;  %p1716_p9 = scmp.lt.s32.totalorder %s2345_s30, %s2385_s5 }
 0x4bb   : > { %p1717_p10 = scmp.lt.s32.totalorder %s1715_s13, %s1711_s10 }
 0x4bc   : > { %p1713_p7 = pnand %p1712_p4, %p1831_p5 }
 0x4bd   : > { %p1718_p11 = por %p1717_p10, %p1716_p9 }
 0x4be   : > { %p1714_p8 = pneg %p1713_p7 }
 0x4c0   : > { %p1719_p12 = pnand %p1718_p11, %p1714_p8 }
 0x4c2   : > { %1722 = shalt.err (!%p1719_p12)
}
 0x4c3   : > { %1533 = dma.vmem_to_hbm [thread:$0]  (%p1831_p5), %s1358_s23, 128, %s2345_s30, %s1343_s6  }
 0x4c4 PF: > { %p1539_p13 = scmp.ge.s32.totalorder %s1757_s21, 2  ;;  %s1369_s16 = sand.u32 1, %s1745_s18  }
 0x4c5   : > { %s1370_s17 = scalar_lea.sflag [#allocation3], %s1369_s16 }
 0x4c6   : > { %p1536_p0 = pnand %p1539_p13, %p1835_p6 }
 0x4c8   : > { %p1537_p1 = pneg %p1536_p0 }
 0x4ca   : > { %1740 = dma.done.wait (%p1537_p1), %s1370_s17, 128  }
 0x4cb   : > { %1742 = vsyncadd (%p1537_p1), %s1370_s17, 4294967168  ;;  %p15_p2 = scmp.ge.s32.totalorder %s1818_s24, 4   ;;  %s2431_s18 = smov %s1749_s19 }
 0x4cc   : > { %s2432_s19 = smov %s1753_s20  ;;  %s2433_s20 = smov %s1829_s27 }
 0x4cd   : > { %s2434_s21 = smov %s1818_s24  ;;  %17 = sbr.rel (!%p15_p2) target bundleno = 3 (0x3), region = 75 }
 0x4d2   :  { %1375 = vsyncpa [#allocation3], 1 }
 0x4d3   :  { %1377 = vsyncpa [#allocation3 + $0x1], 1 }

</bundles_post_ra>
